<compile_context>
chip_gen: v6e
topology: v6e:2x2x1
jax: 0.10.0
libtpu: 0.0.40
codegen_flags: <defaults>
</compile_context>

<pallas_src>
from math import ceil
from types import SimpleNamespace

import numpy as np
import jax
import jax.numpy as jnp
from jax.experimental import pallas as pl
from jax.experimental.pallas import tpu as pltpu

IMAGENET_DATASET_MEAN = (0.485, 0.456, 0.406)
IMAGENET_DATASET_STD = (0.229, 0.224, 0.225)

# Explicit scoped-VMEM budget: 32 MiB = default on v6e/v7x, 2x the v5e default, well under
# v7x's 64 MiB physical VMEM.  Re-derive per-tile at real resolutions.
_VMEM_LIMIT = 32 * 1024 * 1024


# ----------------------------------------------------------------------------
# shape / padding helpers (pure python, same math as the PyTorch reference)
# ----------------------------------------------------------------------------
def _shapes(image_shape, network_shape):
    h, w = image_shape
    input_ratio = w / h
    output_ratio = network_shape[1] / network_shape[0]
    if output_ratio > input_ratio:
        ratio = network_shape[0] / h
    else:
        ratio = network_shape[1] / w
    return (ceil(h * ratio - 0.5), ceil(w * ratio - 0.5)), ratio


def _paddings(image_shape, network_shape):
    cur_h, cur_w = image_shape
    h, w = network_shape
    pad_top, pad_bottom = (h - cur_h) // 2, h - cur_h - (h - cur_h) // 2
    pad_left, pad_right = (w - cur_w) // 2, w - cur_w - (w - cur_w) // 2
    return pad_left, pad_right, pad_top, pad_bottom


def _aa_bilinear_matrix(in_size, out_size):
    """Row-stochastic interpolation matrix matching torch bilinear antialias."""
    W = np.zeros((out_size, in_size), dtype=np.float32)
    scale = in_size / out_size
    support = scale if scale >= 1.0 else 1.0          # interp_size/2 == 1 for bilinear
    invscale = (1.0 / scale) if scale >= 1.0 else 1.0
    for i in range(out_size):
        center = scale * (i + 0.5)
        xmin = max(int(center - support + 0.5), 0)
        xmax = min(int(center + support + 0.5), in_size)
        if xmax <= xmin:
            xmin = min(max(xmin, 0), in_size - 1)
            xmax = xmin + 1
        idx = np.arange(xmin, xmax)
        w = np.maximum(0.0, 1.0 - np.abs((idx - center + 0.5) * invscale))
        s = w.sum()
        w = w / s if s > 0 else np.full_like(w, 1.0 / len(w))
        W[i, xmin:xmax] = w
    return W


def _row_tile(h, max_tile=256):
    """Largest multiple-of-8 divisor of h that is <= max_tile (full extent otherwise)."""
    if h % 8 != 0:
        return h            # (8,128) rule: only legal block is the full extent
    if h <= max_tile:
        return h
    best = 8
    for t in range(8, max_tile + 1, 8):
        if h % t == 0:
            best = t
    return best


# ----------------------------------------------------------------------------
# Pallas kernels
# ----------------------------------------------------------------------------
def pallas_separable_resample(x, Wy, WxT, scale=None, shift=None):
    """out[p] = (Wy @ x[p] @ WxT) * scale[p] + shift[p]  for every plane p in B*C.

    One grid step per plane (parallel -> both v7x TensorCores), interpolation
    matrices resident in VMEM via full-array blocks, contraction order chosen to
    minimise the intermediate tile.  The per-plane affine lets ImageNet
    normalization fuse into the preprocess resize (the matrices are row-stochastic,
    so the affine commutes with the resize).
    """
    B, C, Hin, Win = x.shape
    Hout, Wout = Wy.shape[0], WxT.shape[1]
    BC = B * C
    Wy = jnp.asarray(Wy, jnp.float32)
    WxT = jnp.asarray(WxT, jnp.float32)
    if scale is None:
        scale = jnp.ones((BC,), jnp.float32)
    if shift is None:
        shift = jnp.zeros((BC,), jnp.float32)
    xf = x.reshape(BC, Hin, Win).astype(jnp.float32)

    # Smaller intermediate: Wy-first -> (Hout, Win); Wx-first -> (Hin, Wout).
    wy_first = (Hout * Win) <= (Hin * Wout)

    def kernel(scale_ref, shift_ref, wy_ref, wxt_ref, x_ref, o_ref):
        p = pl.program_id(0)
        plane = x_ref[...]
        if wy_first:
            t = jnp.dot(wy_ref[...], plane, preferred_element_type=jnp.float32)
            r = jnp.dot(t, wxt_ref[...], preferred_element_type=jnp.float32)
        else:
            t = jnp.dot(plane, wxt_ref[...], preferred_element_type=jnp.float32)
            r = jnp.dot(wy_ref[...], t, preferred_element_type=jnp.float32)
        o_ref[...] = r * scale_ref[p] + shift_ref[p]

    # TODO(synk): at real resolutions also tile Hout into 128/256-row output blocks.
    out = pl.pallas_call(
        kernel,
        out_shape=jax.ShapeDtypeStruct((BC, Hout, Wout), jnp.float32),
        grid=(BC,),
        in_specs=[
            pl.BlockSpec(memory_space=pltpu.MemorySpace.SMEM),     # scale (BC,)
            pl.BlockSpec(memory_space=pltpu.MemorySpace.SMEM),     # shift (BC,)
            pl.BlockSpec((Hout, Hin), lambda p: (0, 0)),
            pl.BlockSpec((Win, Wout), lambda p: (0, 0)),
            pl.BlockSpec((None, Hin, Win), lambda p: (p, 0, 0)),
        ],
        out_specs=pl.BlockSpec((None, Hout, Wout), lambda p: (p, 0, 0)),
        compiler_params=pltpu.CompilerParams(
            dimension_semantics=("parallel",), vmem_limit_bytes=_VMEM_LIMIT),
    )(scale, shift, Wy, WxT, xf)
    return out.reshape(B, C, Hout, Wout)


def pallas_resize_bilinear_aa(x, out_hw, scale=None, shift=None):
    """Antialiased bilinear resize (torch-compatible) with optional fused affine."""
    Hin, Win = x.shape[2:]
    Hout, Wout = out_hw
    Wy = _aa_bilinear_matrix(Hin, Hout)
    WxT = _aa_bilinear_matrix(Win, Wout).T
    return pallas_separable_resample(x, Wy, WxT, scale=scale, shift=shift)


def generate_rays(camera_intrinsics, image_shape, noisy=False):
    """Unit ray directions (lane-dense, channel-first) + (azimuth, polar) angles.

    u/v come from two in-kernel 2-D iotas on (TH, W) row tiles (full vregs, no
    float floor/divide), output is a 4-D (B, 3, H, W) tensor written per channel.
    """
    del noisy
    B = camera_intrinsics.shape[0]
    Hs, Ws = image_shape
    TH = _row_tile(Hs)
    Kinv = jnp.linalg.inv(camera_intrinsics.astype(jnp.float32)).reshape(B, 9)

    def kernel(kinv_ref, rays_ref):
        b = pl.program_id(0)
        r0 = pl.program_id(1) * TH
        vi = jax.lax.broadcasted_iota(jnp.int32, (TH, Ws), 0) + r0
        ui = jax.lax.broadcasted_iota(jnp.int32, (TH, Ws), 1)
        v = vi.astype(jnp.float32) + 0.5
        u = ui.astype(jnp.float32) + 0.5
        dx = kinv_ref[b, 0] * u + kinv_ref[b, 1] * v + kinv_ref[b, 2]
        dy = kinv_ref[b, 3] * u + kinv_ref[b, 4] * v + kinv_ref[b, 5]
        dz = kinv_ref[b, 6] * u + kinv_ref[b, 7] * v + kinv_ref[b, 8]
        inv_n = jax.lax.rsqrt(dx * dx + dy * dy + dz * dz)
        rays_ref[0] = dx * inv_n
        rays_ref[1] = dy * inv_n
        rays_ref[2] = dz * inv_n

    rays4 = pl.pallas_call(
        kernel,
        out_shape=jax.ShapeDtypeStruct((B, 3, Hs, Ws), jnp.float32),
        grid=(B, Hs // TH),
        in_specs=[pl.BlockSpec(memory_space=pltpu.MemorySpace.SMEM)],
        out_specs=pl.BlockSpec((None, 3, TH, Ws), lambda b, r: (b, 0, r, 0)),
        compiler_params=pltpu.CompilerParams(
            dimension_semantics=("parallel", "parallel"), vmem_limit_bytes=_VMEM_LIMIT),
    )(Kinv)

    rays = rays4.reshape(B, 3, Hs * Ws)      # lane-dense (B, 3, HW); no (HW, 3) transpose
    # TODO(synk): atan2/acos have no documented Mosaic lowering guarantee — the angle trig
    # stays in plain JAX glue, computed straight off the lane-dense channel-first layout.
    theta = jnp.arctan2(rays[:, 0], rays[:, 2])
    phi = jnp.arccos(jnp.clip(rays[:, 1], -1.0, 1.0))
    angles = jnp.stack([theta, phi], axis=1)  # (B, 2, HW), lane-dense
    return rays, angles


def pallas_depth_to_points(camera_intrinsics, depth):
    """points = depth * (dx/dz, dy/dz, 1)  with (dx,dy,dz) = K^-1 @ (u,v,1).

    Exact rewrite of the reference generate_rays(angles) + spherical_zbuffer_to_euclidean
    chain (x = z*tan(theta), y = z/tan(phi)/cos(theta), z = z) without transcendentals,
    intermediate angle tensors, or trig singularities.  Tiled over (batch, row blocks),
    4-D lane-dense output, exact division (no approx reciprocal).
    """
    B, _, H, W = depth.shape
    TH = _row_tile(H)
    Kinv = jnp.linalg.inv(camera_intrinsics.astype(jnp.float32)).reshape(B, 9)

    def kernel(kinv_ref, z_ref, o_ref):
        b = pl.program_id(0)
        r0 = pl.program_id(1) * TH
        vi = jax.lax.broadcasted_iota(jnp.int32, (TH, W), 0) + r0
        ui = jax.lax.broadcasted_iota(jnp.int32, (TH, W), 1)
        v = vi.astype(jnp.float32) + 0.5
        u = ui.astype(jnp.float32) + 0.5
        dx = kinv_ref[b, 0] * u + kinv_ref[b, 1] * v + kinv_ref[b, 2]
        dy = kinv_ref[b, 3] * u + kinv_ref[b, 4] * v + kinv_ref[b, 5]
        dz = kinv_ref[b, 6] * u + kinv_ref[b, 7] * v + kinv_ref[b, 8]
        inv_dz = 1.0 / dz                       # exact (dz == 1 for a pinhole K)
        z = z_ref[0]                            # (TH, W)
        o_ref[0] = z * dx * inv_dz
        o_ref[1] = z * dy * inv_dz
        o_ref[2] = z

    return pl.pallas_call(
        kernel,
        out_shape=jax.ShapeDtypeStruct((B, 3, H, W), jnp.float32),
        grid=(B, H // TH),
        in_specs=[
            pl.BlockSpec(memory_space=pltpu.MemorySpace.SMEM),
            pl.BlockSpec((None, 1, TH, W), lambda b, r: (b, 0, r, 0)),
        ],
        out_specs=pl.BlockSpec((None, 3, TH, W), lambda b, r: (b, 0, r, 0)),
        compiler_params=pltpu.CompilerParams(
            dimension_semantics=("parallel", "parallel"), vmem_limit_bytes=_VMEM_LIMIT),
    )(Kinv, depth.astype(jnp.float32))


# ----------------------------------------------------------------------------
# pre / post processing
# ----------------------------------------------------------------------------
def _preprocess(rgbs, intrinsics, shapes, pads, ratio, output_shapes,
                norm_scale=None, norm_shift=None):
    pad_left, pad_right, pad_top, pad_bottom = pads
    # ImageNet normalization fused into the resize (affine commutes with the
    # row-stochastic resize matrices).
    rgbs = pallas_resize_bilinear_aa(rgbs, shapes, scale=norm_scale, shift=norm_shift)
    rgbs = jnp.pad(rgbs, ((0, 0), (0, 0), (pad_top, pad_bottom), (pad_left, pad_right)))
    if intrinsics is not None:
        intrinsics = intrinsics.astype(jnp.float32)
        intrinsics = intrinsics.at[:, 0, 0].multiply(ratio)
        intrinsics = intrinsics.at[:, 1, 1].multiply(ratio)
        intrinsics = intrinsics.at[:, 0, 2].set(intrinsics[:, 0, 2] * ratio + pad_left)
        intrinsics = intrinsics.at[:, 1, 2].set(intrinsics[:, 1, 2] * ratio + pad_top)
        return rgbs, intrinsics
    return rgbs, None


def _postprocess(predictions, intrinsics, shapes, pads, ratio, original_shapes):
    pad_left, pad_right, pad_top, pad_bottom = pads
    # Heads are already averaged inside the decoder kernel (resize is linear, so
    # averaging before the resize equals the reference's resize-then-average).
    pred = sum(predictions) / len(predictions)
    hp, wp = pred.shape[2:]
    net_h, net_w = shapes
    H, W = original_shapes
    # Compose resize-to-network -> crop -> resize-to-original into ONE separable
    # resample:  out = (Wy2 @ Wy1[rows]) @ x @ (Wx1T[:, cols] @ Wx2T).
    Wy1 = _aa_bilinear_matrix(hp, net_h)[pad_top:net_h - pad_bottom, :]        # (h, hp)
    Wx1T = _aa_bilinear_matrix(wp, net_w).T[:, pad_left:net_w - pad_right]     # (wp, w)
    Wy2 = _aa_bilinear_matrix(Wy1.shape[0], H)                                 # (H, h)
    Wx2T = _aa_bilinear_matrix(Wx1T.shape[1], W).T                             # (w, W)
    Wy_total = Wy2 @ Wy1                                                       # (H, hp)
    WxT_total = Wx1T @ Wx2T                                                    # (wp, W)
    preds = pallas_separable_resample(pred, Wy_total, WxT_total)
    if intrinsics is not None:
        intrinsics = intrinsics.at[:, 0, 0].divide(ratio)
        intrinsics = intrinsics.at[:, 1, 1].divide(ratio)
        intrinsics = intrinsics.at[:, 0, 2].set((intrinsics[:, 0, 2] - pad_left) / ratio)
        intrinsics = intrinsics.at[:, 1, 2].set((intrinsics[:, 1, 2] - pad_top) / ratio)
    return preds, intrinsics


# ----------------------------------------------------------------------------
# synthetic UniDepthV1 (deterministic init; structure only — not a checkpoint)
# ----------------------------------------------------------------------------
class SyntheticDinoVitEncoder:  # 'dino' in class name -> dino cls-add branch
    cls_add_fused = True        # the DINO cls-token add is done inside the kernel

    def __init__(self, key, patch=14, in_ch=3, dim=32, n_layers=2):
        self.patch, self.in_ch, self.dim, self.n_layers = patch, in_ch, dim, n_layers
        keys = jax.random.split(key, 1 + 2 * n_layers)
        s = 0.05
        pdim = in_ch * patch * patch
        self.w_embed = s * jax.random.normal(keys[0], (pdim, dim), jnp.float32)
        self.b_embed = jnp.zeros((1, dim), jnp.float32)
        self.wl = jnp.stack([s * jax.random.normal(keys[1 + 2 * i], (dim, dim), jnp.float32)
                             for i in range(n_layers)])                   # (L, D, D)
        self.bl = jnp.zeros((n_layers, 1, dim), jnp.float32)
        self.wc = jnp.stack([s * jax.random.normal(keys[2 + 2 * i], (dim, dim), jnp.float32)
                             for i in range(n_layers)])                   # (L, D, D)
        self.bc = jnp.zeros((n_layers, 1, dim), jnp.float32)

    def __call__(self, rgbs):
        B, C, Hn, Wn = rgbs.shape
        P, D, L = self.patch, self.dim, self.n_layers
        hp, wp = Hn // P, Wn // P
        N = hp * wp
        Cpp = C * P * P
        patches = rgbs.reshape(B, C, hp, P, wp, P).transpose(0, 2, 4, 1, 3, 5)
        patches = patches.reshape(B, N, Cpp)
        inv_n = 1.0 / N

        def kernel(patch_ref, we_ref, be_ref, wl_ref, bl_ref, wc_ref, bc_ref,
                   feats_ref, cls_ref):
            tok = jnp.dot(patch_ref[...], we_ref[...],
                          preferred_element_type=jnp.float32) + be_ref[...]   # (N, D)
            for l in range(L):                                   # static unroll, L small
                feat = jnp.dot(tok, wl_ref[l],
                               preferred_element_type=jnp.float32) + bl_ref[l]
                # per-batch token mean as an in-kernel sublane reduce (no dense pool matmul)
                pooled = jnp.sum(feat, axis=0, keepdims=True) * inv_n         # (1, D)
                cls = jnp.dot(pooled, wc_ref[l],
                              preferred_element_type=jnp.float32) + bc_ref[l]
                cls_ref[l] = cls
                feats_ref[l] = feat + cls                        # fused DINO cls-token add

        # TODO(synk): at real DINOv2 sizes (D~1024, N~1.3k) this needs (M,N,K) 128/256
        # tiling with bf16 operands and a f32 VMEM accumulator; synthetic dims fit whole.
        feats, cls = pl.pallas_call(
            kernel,
            out_shape=(jax.ShapeDtypeStruct((B, L, N, D), jnp.float32),
                       jax.ShapeDtypeStruct((B, L, 1, D), jnp.float32)),
            grid=(B,),
            in_specs=[
                pl.BlockSpec((None, N, Cpp), lambda b: (b, 0, 0)),
                pl.BlockSpec((Cpp, D), lambda b: (0, 0)),
                pl.BlockSpec((1, D), lambda b: (0, 0)),
                pl.BlockSpec((L, D, D), lambda b: (0, 0, 0)),
                pl.BlockSpec((L, 1, D), lambda b: (0, 0, 0)),
                pl.BlockSpec((L, D, D), lambda b: (0, 0, 0)),
                pl.BlockSpec((L, 1, D), lambda b: (0, 0, 0)),
            ],
            out_specs=(pl.BlockSpec((None, L, N, D), lambda b: (b, 0, 0, 0)),
                       pl.BlockSpec((None, L, 1, D), lambda b: (b, 0, 0, 0))),
            compiler_params=pltpu.CompilerParams(
                dimension_semantics=("parallel",), vmem_limit_bytes=_VMEM_LIMIT),
        )(patches, self.w_embed, self.b_embed, self.wl, self.bl, self.wc, self.bc)

        outs = [feats[:, l] for l in range(L)]            # each (B, N, D), cls already added
        cls_list = [cls[:, l, 0] for l in range(L)]       # each (B, D)
        return outs, cls_list


class SyntheticPixelDecoder:
    def __init__(self, key, dim, hp, wp, n_layers=2):
        self.dim, self.hp, self.wp, self.n_layers = dim, hp, wp, n_layers
        self.test_fixed_camera = False
        self.skip_camera = False
        keys = jax.random.split(key, 1 + n_layers)
        s = 0.05
        self.w_k = s * jax.random.normal(keys[0], (dim, 9), jnp.float32)
        self.b_k = jnp.zeros((1, 9), jnp.float32)
        # Depth-head weights kept as (L, 1, D): the head is evaluated as a D-contraction
        # against the (N, D) features so the per-batch output row is lane-dense (1, N).
        self.wd = jnp.stack([s * jax.random.normal(keys[1 + i], (1, dim), jnp.float32)
                             for i in range(n_layers)])                   # (L, 1, D)
        self.bd = jnp.zeros((n_layers, 1, 1), jnp.float32)

    def __call__(self, inputs, image_metas):
        enc = inputs["encoder_outputs"]
        cls = inputs["cls_tokens"]
        L = self.n_layers
        B, N, D = enc[-1].shape
        feats = jnp.stack(enc, axis=1)                     # (B, L, N, D)
        cls_last = cls[-1].reshape(B, 1, D)
        inv_L = 1.0 / L

        def kernel(cls_ref, wk_ref, bk_ref, wd_ref, bd_ref, feats_ref, k_ref, d_ref):
            # camera (K) head
            k_ref[...] = jnp.dot(cls_ref[...], wk_ref[...],
                                 preferred_element_type=jnp.float32) + bk_ref[...]
            # depth heads: accumulate the across-head average in registers and emit ONE
            # lane-dense (1, N) depth row — no (BN, 1) masked stores, no extra HBM pass
            # for the mean in postprocess.
            acc = None
            for l in range(L):                             # static unroll
                d = jax.lax.dot_general(
                    wd_ref[l], feats_ref[l],
                    dimension_numbers=(((1,), (1,)), ((), ())),
                    preferred_element_type=jnp.float32) + bd_ref[l]        # (1, N)
                e = jnp.exp(d)                             # positive depth
                acc = e if acc is None else acc + e
            d_ref[...] = acc * inv_L

        pred_k, depth = pl.pallas_call(
            kernel,
            out_shape=(jax.ShapeDtypeStruct((B, 1, 9), jnp.float32),
                       jax.ShapeDtypeStruct((B, 1, N), jnp.float32)),
            grid=(B,),
            in_specs=[
                pl.BlockSpec((None, 1, D), lambda b: (b, 0, 0)),
                pl.BlockSpec((D, 9), lambda b: (0, 0)),
                pl.BlockSpec((1, 9), lambda b: (0, 0)),
                pl.BlockSpec((L, 1, D), lambda b: (0, 0, 0)),
                pl.BlockSpec((L, 1, 1), lambda b: (0, 0, 0)),
                pl.BlockSpec((None, L, N, D), lambda b: (b, 0, 0, 0)),
            ],
            out_specs=(pl.BlockSpec((None, 1, 9), lambda b: (b, 0, 0)),
                       pl.BlockSpec((None, 1, N), lambda b: (b, 0, 0))),
            compiler_params=pltpu.CompilerParams(
                dimension_semantics=("parallel",), vmem_limit_bytes=_VMEM_LIMIT),
        )(cls_last, self.w_k, self.b_k, self.wd, self.bd, feats)

        pred_K = pred_k.reshape(B, 3, 3)
        preds = [depth.reshape(B, 1, self.hp, self.wp)]    # heads already averaged in-kernel
        features = enc[-1]
        rays = inputs.get("rays", None)
        return pred_K, preds, features, rays


class SyntheticUniDepthV1:
    # TODO(synk): real UniDepthV1 loads pretrained DINOv2 + camera/depth decoders;
    # here encoder/decoder are small deterministic synthetic stand-ins.
    def __init__(self, key, image_shape=(28, 42), patch=14, dim=32, n_layers=2):
        self.image_shape = image_shape
        k1, k2 = jax.random.split(key)
        self.pixel_encoder = SyntheticDinoVitEncoder(k1, patch=patch, dim=dim, n_layers=n_layers)
        self.pixel_decoder = SyntheticPixelDecoder(
            k2, dim=dim, hp=image_shape[0] // patch, wp=image_shape[1] // patch, n_layers=n_layers)


# ----------------------------------------------------------------------------
# unidepthv1_forward (mirrors the PyTorch reference flow)
# ----------------------------------------------------------------------------
def unidepthv1_forward(model, rgbs, intrinsics, skip_camera, return_raw_preds=False):
    B, C, H, W = rgbs.shape

    # ImageNet normalization folded into the preprocess resize (scale=1/std, shift=-mean/std)
    mean = np.asarray(IMAGENET_DATASET_MEAN, np.float32)
    std = np.asarray(IMAGENET_DATASET_STD, np.float32)
    inv_std = 1.0 / std
    norm_scale = jnp.asarray(np.tile(inv_std, B))
    norm_shift = jnp.asarray(np.tile(-mean * inv_std, B))

    (h, w), ratio = _shapes((H, W), model.image_shape)
    pads = _paddings((h, w), model.image_shape)
    rgbs, gt_intrinsics = _preprocess(
        rgbs, intrinsics, (h, w), pads, ratio, model.image_shape,
        norm_scale=norm_scale, norm_shift=norm_shift)

    encoder_outputs, cls_tokens = model.pixel_encoder(rgbs)
    # DINO cls-token add is fused inside the encoder kernel (no extra HBM pass).
    if ("dino" in model.pixel_encoder.__class__.__name__.lower()
            and not getattr(model.pixel_encoder, "cls_add_fused", False)):
        encoder_outputs = [x + y[:, None, :] for x, y in zip(encoder_outputs, cls_tokens)]

    inputs = {"encoder_outputs": encoder_outputs, "cls_tokens": cls_tokens, "image": rgbs}
    if gt_intrinsics is not None:
        rays, angles = generate_rays(gt_intrinsics, model.image_shape, noisy=False)
        inputs["rays"] = rays          # lane-dense (B, 3, H*W) channel-first layout
        inputs["angles"] = angles      # lane-dense (B, 2, H*W)
        inputs["K"] = gt_intrinsics
        model.pixel_decoder.test_fixed_camera = True
        model.pixel_decoder.skip_camera = skip_camera

    pred_intrinsics, predictions, features, rays = model.pixel_decoder(inputs, {})

    predictions, pred_intrinsics = _postprocess(
        predictions, pred_intrinsics, model.image_shape, pads, ratio, (H, W))

    if return_raw_preds:
        return inputs, predictions

    intrinsics_out = gt_intrinsics if gt_intrinsics is not None else pred_intrinsics
    # points = depth * (dx/dz, dy/dz, 1) — exact rewrite of the reference
    # generate_rays(angles) + spherical_zbuffer_to_euclidean chain.
    points_3d = pallas_depth_to_points(intrinsics_out, predictions)

    outputs = {
        "intrinsics": intrinsics_out,
        "points": points_3d,
        "depth": predictions[:, -1:],
        "depth_feats": features,
        "rays": rays,
        "padding": pads,
    }
    model.pixel_decoder.test_fixed_camera = False
    model.pixel_decoder.skip_camera = False
    return inputs, outputs


# ----------------------------------------------------------------------------
# UniDepthDepth module
# ----------------------------------------------------------------------------
class UniDepthDepth:
    def __init__(self, cfg, return_raw_preds=False):
        self.cfg = cfg
        self.return_raw_preds = return_raw_preds
        key = jax.random.PRNGKey(0)
        if "cnvnxtl" in cfg.model.name:
            self.depth_prediction_model = SyntheticUniDepthV1(key)
        elif "vit" in cfg.model.name:
            self.depth_prediction_model = SyntheticUniDepthV1(key)
        self.skip_camera = True

    def get_depth(self, img, intrinsics):
        _, outputs = unidepthv1_forward(
            self.depth_prediction_model, img, intrinsics, self.skip_camera,
            return_raw_preds=self.return_raw_preds)
        return outputs

    def forward(self, inputs):
        input_img = inputs[("color_aug", 0, 0)]
        intrinsics = inputs.get(("K_src", 0), None)
        depth_inputs, outputs = unidepthv1_forward(
            self.depth_prediction_model, input_img, intrinsics, self.skip_camera,
            return_raw_preds=self.return_raw_preds)
        return depth_inputs, outputs

    __call__ = forward


if __name__ == "__main__":
    cfg = SimpleNamespace(model=SimpleNamespace(name="unidepth_vit_synthetic"))
    model = UniDepthDepth(cfg)

    key = jax.random.PRNGKey(0)
    B, C, H, W = 2, 3, 16, 20
    img = jax.random.uniform(jax.random.fold_in(key, 1), (B, C, H, W), dtype=jnp.float32)
    K = jnp.broadcast_to(
        jnp.array([[20.0, 0.0, 10.0], [0.0, 20.0, 8.0], [0.0, 0.0, 1.0]], jnp.float32),
        (B, 3, 3))

    inputs = {("color_aug", 0, 0): img, ("K_src", 0): K}
    depth_inputs, outputs = model.forward(inputs)

    jax.block_until_ready(outputs["points"])
    jax.block_until_ready(outputs["depth"])
    jax.block_until_ready(outputs["rays"])

    assert outputs["depth"].shape == (B, 1, H, W)
    assert outputs["points"].shape == (B, 3, H, W)
    assert outputs["intrinsics"].shape == (B, 3, 3)
    assert bool(jnp.isfinite(outputs["points"]).all())
    assert bool(jnp.isfinite(outputs["depth"]).all())
    assert bool(jnp.isfinite(outputs["rays"]).all())

    print("KERNEL_OK")
</pallas_src>

<mosaic_0001>
module attributes {stable_mosaic.version = 11 : i64} {
  func.func @kernel(%arg0: i32, %arg1: memref<6xf32, #tpu.memory_space<smem>>, %arg2: memref<6xf32, #tpu.memory_space<smem>>, %arg3: memref<28x16xf32, #tpu.memory_space<vmem>>, %arg4: memref<20x35xf32, #tpu.memory_space<vmem>>, %arg5: memref<1x16x20xf32, #tpu.memory_space<vmem>>, %arg6: memref<1x28x35xf32, #tpu.memory_space<vmem>>) attributes {dimension_semantics = [#tpu.dimension_semantics<parallel>], iteration_bounds = array<i64: 6>, scalar_prefetch = 0 : i64, scratch_operands = 0 : i64, tpu.core_type = #tpu.core_type<tc>, window_params = [{transform_indices = @transform_0, window_bounds = array<i64: 6>}, {transform_indices = @transform_1, window_bounds = array<i64: 6>}, {pipeline_mode = #tpu.pipeline_mode<synchronous>, transform_indices = @transform_2, window_bounds = array<i64: 28, 16>}, {pipeline_mode = #tpu.pipeline_mode<synchronous>, transform_indices = @transform_3, window_bounds = array<i64: 20, 35>}, {transform_indices = @transform_4, window_bounds = array<i64: 1, 16, 20>}, {transform_indices = @transform_5, window_bounds = array<i64: 1, 28, 35>}]} {
    %c0 = arith.constant 0 : index
    %c0_0 = arith.constant 0 : index
    %c0_1 = arith.constant 0 : index
    %0 = vector.load %arg5[%c0, %c0_0, %c0_1] : memref<1x16x20xf32, #tpu.memory_space<vmem>>, vector<1x16x20xf32>
    %1 = vector.shape_cast %0 : vector<1x16x20xf32> to vector<16x20xf32>
    %c0_2 = arith.constant 0 : index
    %c0_3 = arith.constant 0 : index
    %2 = vector.load %arg3[%c0_2, %c0_3] : memref<28x16xf32, #tpu.memory_space<vmem>>, vector<28x16xf32>
    %cst = arith.constant dense<0.000000e+00> : vector<28x20xf32>
    %3 = tpu.matmul %2, %1, %cst {dimension_numbers = #tpu.dot_dimension_numbers<[1], [0], [0], [1], [0, 0, 1, 1], [], []>} : vector<28x16xf32>, vector<16x20xf32>, vector<28x20xf32> -> vector<28x20xf32>
    %c0_4 = arith.constant 0 : index
    %c0_5 = arith.constant 0 : index
    %4 = vector.load %arg4[%c0_4, %c0_5] : memref<20x35xf32, #tpu.memory_space<vmem>>, vector<20x35xf32>
    %cst_6 = arith.constant dense<0.000000e+00> : vector<28x35xf32>
    %5 = tpu.matmul %3, %4, %cst_6 {dimension_numbers = #tpu.dot_dimension_numbers<[1], [0], [0], [1], [0, 0, 1, 1], [], []>} : vector<28x20xf32>, vector<20x35xf32>, vector<28x35xf32> -> vector<28x35xf32>
    %6 = arith.index_cast %arg0 : i32 to index
    %7 = memref.load %arg1[%6] : memref<6xf32, #tpu.memory_space<smem>>
    %8 = vector.broadcast %7 : f32 to vector<28x35xf32>
    %9 = arith.mulf %5, %8 : vector<28x35xf32>
    %10 = arith.index_cast %arg0 : i32 to index
    %11 = memref.load %arg2[%10] : memref<6xf32, #tpu.memory_space<smem>>
    %12 = vector.broadcast %11 : f32 to vector<28x35xf32>
    %13 = arith.addf %9, %12 : vector<28x35xf32>
    %c0_7 = arith.constant 0 : index
    %c0_8 = arith.constant 0 : index
    %c0_9 = arith.constant 0 : index
    %14 = vector.load %arg6[%c0_7, %c0_8, %c0_9] : memref<1x28x35xf32, #tpu.memory_space<vmem>>, vector<1x28x35xf32>
    %15 = vector.shape_cast %14 : vector<1x28x35xf32> to vector<28x35xf32>
    %16 = vector.shape_cast %13 : vector<28x35xf32> to vector<1x28x35xf32>
    tpu.vector_store %arg6[%c0_7, %c0_8, %c0_9], %16 {strides = array<i32>} : memref<1x28x35xf32, #tpu.memory_space<vmem>>, vector<1x28x35xf32>,
    return
  }
  func.func @transform_0(%arg0: i32) -> i32 {
    %c0_i32 = arith.constant 0 : i32
    %c0_i32_0 = arith.constant 0 : i32
    return %c0_i32 : i32
  }
  func.func @transform_1(%arg0: i32) -> i32 {
    %c0_i32 = arith.constant 0 : i32
    %c0_i32_0 = arith.constant 0 : i32
    return %c0_i32 : i32
  }
  func.func @transform_2(%arg0: i32) -> (i32, i32) {
    %c0_i32 = arith.constant 0 : i32
    %c0_i32_0 = arith.constant 0 : i32
    %c0_i32_1 = arith.constant 0 : i32
    return %c0_i32, %c0_i32_0 : i32, i32
  }
  func.func @transform_3(%arg0: i32) -> (i32, i32) {
    %c0_i32 = arith.constant 0 : i32
    %c0_i32_0 = arith.constant 0 : i32
    %c0_i32_1 = arith.constant 0 : i32
    return %c0_i32, %c0_i32_0 : i32, i32
  }
  func.func @transform_4(%arg0: i32) -> (i32, i32, i32) {
    %c0_i32 = arith.constant 0 : i32
    %c0_i32_0 = arith.constant 0 : i32
    %c0_i32_1 = arith.constant 0 : i32
    return %arg0, %c0_i32, %c0_i32_0 : i32, i32, i32
  }
  func.func @transform_5(%arg0: i32) -> (i32, i32, i32) {
    %c0_i32 = arith.constant 0 : i32
    %c0_i32_0 = arith.constant 0 : i32
    %c0_i32_1 = arith.constant 0 : i32
    return %arg0, %c0_i32, %c0_i32_0 : i32, i32, i32
  }
}

</mosaic_0001>

<bundles_post_ra>
// kernel: tpu_custom_call.1
= control target key start
LH: loop header
LB: loop body
LE: loop exit
PB: predicated region body
PF: predicated region fallthrough
CT: control target
= control target key end

     0   :  { %10 = vsyncpa [#allocation5], 0  ;;  %s1132_s0 = inlined_call_operand.vmem [shape: f32[6], index: 0, kind: input, shape index: {}]   ;;  %s1133_s1 = inlined_call_operand.vmem [shape: f32[6], index: 1, kind: input, shape index: {}]   ;;  %s1134_s2 = inlined_call_operand.vmem [shape: f32[28,16], index: 2, kind: input, shape index: {}]   ;;  %s1135_s3 = inlined_call_operand.vmem [shape: f32[20,35], index: 3, kind: input, shape index: {}]   ;;  %s1136_s4 = inlined_call_operand.hbm [shape: f32[6,16,20], index: 4, kind: input, shape index: {}]   ;;  %s1137_s5 = inlined_call_operand.hbm [shape: f32[6,28,35], index: 5, kind: output, shape index: {}]  }
   0x1   :  { %11 = vsyncpa [#allocation7], 0 }
   0x2   :  { %12 = vsyncpa [#allocation3], 0 }
   0x3   :  { %14 = vsyncpa [#allocation3 + $0x1], 0 }
   0x4   :  { %15 = vsyncpa [#allocation4], 0 }
   0x5   :  { %17 = vsyncpa [#allocation4 + $0x1], 0  ;;  %s911_s18 = smov 0   ;;  %s913_s19 = smov 0  }
   0x6   :  { %s915_s20 = smov 0   ;;  %s917_s21 = smov 0  }
   0x7 LB: > { %s932_s22 = sadd.s32 4294967295, %s871_s21   ;;  %s606_s23 = sadd.s32 4294967294, %s871_s21   ;;  %s871_s21 = sphi %s917_s21, %s1162_s21   ;;  %s867_s20 = sphi %s915_s20, %s1161_s20   ;;  %s863_s19 = sphi %s913_s19, %s1160_s19   ;;  %s859_s18 = sphi %s911_s18, %s1159_s18  }
   0x8   : > { %s936_s24 = sadd.s32 1, %s871_s21   ;;  %s114_s25 = sadd.s32 1, %s867_s20 }
   0x9   : > { %s111_s26 = ssub.s32 %s871_s21, %s936_s24  ;;  %p121_p0 = scmp.ne.s32.totalorder %s867_s20, %s863_s19 }
   0xa   : > { %p112_p1 = scmp.eq.s32.totalorder %s111_s26, 0  ;;  %p122_p2 = scmp.eq.s32.totalorder %s871_s21, 0 }
   0xb   : > { %p127_p3 = scmp.ne.s32.totalorder %s863_s19, %s859_s18  ;;  %p1138_p4 = scmp.eq.s32.totalorder %s932_s22, 0 }
   0xc   : > { %s948_s27 = scalar_select %p112_p1, %s867_s20, %s114_s25  }
   0xd   : > { %p950_p5 = por %p122_p2, %p121_p0  ;;  %p956_p6 = por %p1138_p4, %p127_p3 }
   0xe   : > { %p151_p7 = scmp.eq.s32.totalorder %s932_s22, 5  ;;  %p157_p8 = scmp.eq.s32.totalorder %s606_s23, 5 }
   0xf   : > { %s1144_s29 = scalar_select %p956_p6, 1, 0 }
  0x10   : > { %p607_p9 = scmp.ge.s32.totalorder %s871_s21, 1  ;;  %p164_p10 = scmp.lt.s32.totalorder %s871_s21, 7 }
  0x11   : > { %p963_p11 = por %p151_p7, %p121_p0  ;;  %p967_p12 = por %p157_p8, %p127_p3 }
  0x12   : > { %p971_p13 = pnand %p607_p9, %p164_p10  ;;  %s177_s10 = sshll.u32 %s1132_s0, 4  ;;  %s178_s10 = int_to_ptr.vmem [resolvable:$true] %s177_s10 }
  0x13   : > { %s1145_s30 = scalar_select %p963_p11, 1, 0 }
  0x14   : > { %s1146_s6 = scalar_select %p967_p12, 1, 0 }
  0x15   : > { %s1147_s7 = scalar_select %p971_p13, 1, 0 }
  0x16   : > { %p682_p1 = pneg %p971_p13  ;;  %p699_p0 = scmp.lt.s32.totalorder %s871_s21, 6 }
  0x17   : > { %s188_s14 = sshll.u32 %s1133_s1, 4  ;;  %s741_s16 = scalar_lea.vmem %s178_s10, 16  ;;  %s189_s14 = int_to_ptr.vmem [resolvable:$true] %s188_s14 }
  0x18   : > { %p983_p2 = pnand %p682_p1, %p1138_p4  ;;  %p992_p3 = pnand %p699_p0, %p950_p5 }
  0x19   : > { %p742_p7 = scmp.ne.s32.totalorder %s178_s10, %s741_s16  ;;  %p749_p1 = scmp.lt.s32.totalorder %s178_s10, %s178_s10 }
  0x1a   : > { %s1149_s15 = scalar_select %p992_p3, 1, 0 }
  0x1b   : > { %p743_p8 = pneg %p983_p2  ;;  %p750_p4 = scmp.lt.s32.totalorder %s741_s16, %s741_s16 }
  0x1d   : > { %p744_p9 = pnand %p743_p8, %p742_p7  ;;  %p751_p12 = por %p750_p4, %p749_p1 }
  0x1f   : > { %p745_p10 = pneg %p744_p9 }
  0x21   : > { %p752_p11 = pnand %p751_p12, %p745_p10 }
  0x23   : > { %755 = shalt.err (!%p752_p11)
}
  0x24   : > { %s873_s17 = smov [#allocation2]   ;;  %s205_s23 = sand.u32 1, %s867_s20  }
  0x25   : > { %685 = dma.vmem_to_smem (!%p983_p2), %s178_s10, 16, %s873_s17, [#allocation5]  }
  0x26   : > { %s756_s25 = scalar_lea.vmem %s189_s14, 16  ;;  %p764_p7 = scmp.lt.s32.totalorder %s189_s14, %s189_s14 }
  0x27   : > { %p757_p5 = scmp.ne.s32.totalorder %s189_s14, %s756_s25  ;;  %p765_p9 = scmp.lt.s32.totalorder %s756_s25, %s756_s25 }
  0x29   : > { %p759_p0 = pnand %p757_p5, %p743_p8  ;;  %p766_p13 = por %p765_p9, %p764_p7 }
  0x2b   : > { %p760_p6 = pneg %p759_p0 }
  0x2d   : > { %p767_p3 = pnand %p766_p13, %p760_p6 }
  0x2f   : > { %770 = shalt.err (!%p767_p3)
}
  0x30   : > { %s874_s26 = smov [#allocation6]   ;;  %s611_s28 = sshll.u32 %s205_s23, 4 }
  0x31   : > { %688 = dma.vmem_to_smem (!%p983_p2), %s189_s14, 16, %s874_s26, [#allocation7]  }
  0x32   : > { %s633_s8 = sshll.u32 %s871_s21, 8  ;;  %s209_s13 = scalar_lea.vmem [#allocation8], %s611_s28 }
  0x33   : > { %s1013_s12 = scalar_lea.hbm %s1136_s4, %s633_s8  ;;  %s216_s16 = sshll.u32 %s209_s13, 4  ;;  %s1015_s16 = int_to_ptr.vmem [resolvable:$true] %s216_s16 }
  0x34   : > { %s1017_s17 = scalar_lea.sflag [#allocation3], %s205_s23  ;;  %s771_s11 = scalar_lea.hbm %s1013_s12, 256 }
  0x35   : > { %p772_p4 = scmp.ne.s32.totalorder %s1013_s12, %s771_s11  ;;  %p1150_p6 = scmp.ne.s32.totalorder %s1149_s15, 0 }
  0x36   : > { %s776_s26 = scalar_lea.hbm %s1136_s4, 1536  ;;  %p777_p2 = scmp.lt.s32.totalorder %s1013_s12, %s1136_s4 }
  0x37   : > { %p773_p11 = pneg %p1150_p6  ;;  %p778_p3 = scmp.lt.s32.totalorder %s776_s26, %s771_s11 }
  0x39   : > { %p774_p12 = pnand %p773_p11, %p772_p4  ;;  %p779_p8 = por %p778_p3, %p777_p2 }
  0x3b   : > { %p775_p13 = pneg %p774_p12 }
  0x3d   : > { %p780_p10 = pnand %p779_p8, %p775_p13 }
  0x3f   : > { %783 = shalt.err (!%p780_p10)
}
  0x40   : > { %s784_s23 = scalar_lea.vmem %s1015_s16, 256  ;;  %s875_s28 = smov [#allocation8]  }
  0x41   : > { %p785_p1 = scmp.ne.s32.totalorder %s1015_s16, %s784_s23  ;;  %s789_s10 = sshll.u32 %s875_s28, 4  ;;  %s790_s10 = int_to_ptr.vmem [resolvable:$false] %s789_s10 }
  0x42   : > { %s791_s13 = scalar_lea.vmem %s790_s10, 512  ;;  %p792_p7 = scmp.lt.s32.totalorder %s1015_s16, %s790_s10 }
  0x43   : > { %p787_p5 = pnand %p785_p1, %p773_p11  ;;  %p793_p9 = scmp.lt.s32.totalorder %s791_s13, %s784_s23 }
  0x45   : > { %p788_p0 = pneg %p787_p5  ;;  %p794_p4 = por %p793_p9, %p792_p7 }
  0x47   : > { %p795_p12 = pnand %p794_p4, %p788_p0 }
  0x49   : > { %798 = shalt.err (!%p795_p12)
}
  0x4a   : > { %s876_s11 = smov 128   ;;  %s877_s14 = smov 8  }
  0x4b   : > { %692 = dma.hbm_to_vmem [thread:$0]  (!%p1150_p6), %s1013_s12, 256, %s1015_s16, %s1017_s17, %s876_s11, %s876_s11, %s877_s14  }
  0x4c   : > { %p1151_p11 = scmp.ne.s32.totalorder %s1147_s7, 0 }
  0x4d   : > { %p1152_p13 = scmp.eq.s32.totalorder (!%p1151_p11), %s932_s22, 0 }
  0x4e   : > { %228 = sbr.rel (%p1151_p11) target bundleno = 512 (0x200), region = 40 }
  0x53   : > { %842 = dma.done.wait (%p1152_p13), [#allocation5], 16   ;;  %p1153_p2 = pmov %p1152_p13 }
  0x55   : > { %844 = vsyncadd (%p1153_p2), [#allocation5], 4294967280  ;;  %p1154_p3 = pmov %p1153_p2 }
  0x56   : > { %p1155_p8 = pmov %p1153_p2 }
  0x57   : > { %846 = dma.done.wait (%p1154_p3), [#allocation7], 16  }
  0x58   : > { %848 = vsyncadd (%p1155_p8), [#allocation7], 4294967280  ;;  %s1049_s25 = sand.u32 1, %s863_s19   ;;  %p1156_p6 = scmp.ne.s32.totalorder %s1144_s29, 0 }
  0x59   : > { %s617_s7 = sshll.u32 %s1049_s25, 4  ;;  %s239_s15 = scalar_lea.sflag [#allocation3], %s1049_s25 }
  0x5a   : > { %s242_s12 = scalar_lea.vmem [#allocation8], %s617_s7 }
  0x5b   : > { %850 = dma.done.wait (%p1156_p6), %s239_s15, 256  }
  0x5c   : > { %852 = vsyncadd (%p1156_p6), %s239_s15, 4294967040 }
  0x5d   : > { %247 = sfence }
  0x5e   : > { %v271_v0 = vld [vmem:[%s242_s12 + $0x8] sm:$0xff]  ;;  %v270_v1 = vld [vmem:[%s242_s12] sm:$0xff]  ;;  %vm276_vm0 = vcmask 130048   ;;  %vm390_vm1 = vcmask 1043456   ;;  %vm377_vm2 = vcmask 162816   ;;  %s479_s12 = sld [smem:[#allocation2 + %s932_s22]] }
  0x5f   : > { %v272_v2 = vld [vmem:[%s1134_s2] sm:$0xff]  ;;  %648 = vmatprep.subr.mxu0 %v271_v0  ;;  %v273_v3 = vld [vmem:[%s1134_s2 + $0x8] sm:$0xff]  ;;  %v376_v4 = vld [vmem:[%s1135_s3 + $0x10] sm:$0xf]  ;;  %s485_s16 = sld [smem:[#allocation6 + %s932_s22]]  ;;  %s618_s17 = sshll.u32 %s1049_s25, 5 }
  0x60   : > { %652 = vmatprep.mubr.msk.f32.mxu0 %vm276_vm0, %v272_v2  ;;  %649 = vmatpush3.msra.mxu0 %v271_v0  ;;  %v274_v5 = vld [vmem:[%s1134_s2 + $0x10] sm:$0xff]  ;;  %v275_v6 = vld [vmem:[%s1134_s2 + $0x18] sm:$0xf]  ;;  %v375_v7 = vld [vmem:[%s1135_s3 + $0x8] sm:$0xff]  ;;  %vm491_vm3 = vcmask 285696   ;;  %s269_s26 = scalar_lea.vmem [#allocation9], %s618_s17 }
  0x61   : > { %650 = vmatprep.subr.mxu0 %v270_v1  ;;  %658 = vmatprep.subr.msk.mxu1 %vm390_vm1, %v376_v4  ;;  %v374_v8 = vld [vmem:[%s1135_s3] sm:$0xff]  ;;  %s511_s8 = sshll.u32 %s269_s26, 4  ;;  %s634_s9 = sshll.u32 %s932_s22, 9  ;;  %vm495_vm4 = vcmask 281600   ;;  %s1089_s8 = int_to_ptr.vmem [resolvable:$true] %s511_s8 }
  0x62   : > { %651 = vmatpush3.msra.mxu0 %v270_v1  ;;  %659 = vmatpush3.msk.msra.mxu1 %vm390_vm1, %v376_v4  ;;  %s1087_s28 = scalar_lea.hbm %s1137_s5, %s634_s9  ;;  %s498_s22 = scalar_lea.sflag [#allocation4], %s1049_s25 }
  0x63   : > { %653 = vmatmul.mubr.msk.f32.vlgmr.msra.gmra.mxu0 %vm276_vm0, %v273_v3  ;;  %660 = vmatprep.subr.mxu1 %v375_v7  ;;  %s799_s10 = scalar_lea.vmem %s1089_s8, 512  ;;  %p1157_p1 = scmp.ne.s32.totalorder %s1145_s30, 0 }
  0x64   : > { %655 = vmatprep.mubr.msk.f32.mxu0 %vm276_vm0, %v274_v5  ;;  %661 = vmatpush3.msra.mxu1 %v375_v7  ;;  %v480_v13 = vstv %s479_s12  ;;  %p800_p10 = scmp.ne.s32.totalorder %s1089_s8, %s799_s10  ;;  %s878_s13 = smov [#allocation9]  }
  0x65   : > { %662 = vmatprep.subr.mxu1 %v374_v8  ;;  %v486_v15 = vstv %s485_s16  ;;  %s803_s11 = sshll.u32 %s878_s13, 4  ;;  %s804_s11 = int_to_ptr.vmem [resolvable:$false] %s803_s11 }
  0x66   : > { %663 = vmatpush3.msra.mxu1 %v374_v8  ;;  %p801_p5 = pnand %p800_p10, %p1157_p1  ;;  %s805_s14 = scalar_lea.vmem %s804_s11, 1024 }
  0x67   : > { %656 = vmatmul.mubr.msk.f32.gmra.mxu0 %vm276_vm0, %v275_v6  ;;  %p806_p7 = scmp.lt.s32.totalorder %s1089_s8, %s804_s11  ;;  %p807_p9 = scmp.lt.s32.totalorder %s805_s14, %s799_s10 }
  0x68   : > { %p802_p0 = pneg %p801_p5 }
  0x69   : > { %p808_p4 = por %p807_p9, %p806_p7 }
  0x6b   : > { %p809_p12 = pnand %p808_p4, %p802_p0 }
 0x123   : > { %v654_v9 = vpop.f32.mrf.mxu0 }
 0x125   : > { %v355_v10 = vpop.f32.mrf.mxu0 }
 0x126   : > { %664 = vmatprep.mubr.msk.f32.mxu1 %vm377_vm2, %v355_v10 }
 0x127   : > { %v657_v11 = vpop.f32.mrf.mxu0  ;;  %665 = vmatmul.mubr.msk.f32.vlgmr.msra.gmra.mxu1 %vm377_vm2, %v654_v9 }
 0x129   : > { %v365_v12 = vpop.f32.mrf.mxu0 }
 0x12a   : > { %667 = vmatprep.mubr.msk.f32.mxu1 %vm377_vm2, %v365_v12 }
 0x12b   : > { %668 = vmatmul.mubr.msk.f32.gmra.mxu1 %vm377_vm2, %v657_v11 }
 0x1e7   : > { %v666_v14 = vpop.f32.mrf.mxu1 }
 0x1e8   : > { %v482_v16 = vmul.f32 %v666_v14, %v480_v13 }
 0x1e9   : > { %v460_v17 = vpop.f32.mrf.mxu1 }
 0x1ea   : > { %v488_v18 = vadd.f32 %v486_v15, %v482_v16  ;;  %v481_v19 = vmul.f32 %v480_v13, %v460_v17 }
 0x1eb   : > { %v669_v20 = vpop.f32.mrf.mxu1 }
 0x1ec   : > { %493 = vst.msk [vmem:[%s269_s26 + $0x8] sm:$0xff] %vm491_vm3, %v488_v18  ;;  %v487_v21 = vadd.f32 %v486_v15, %v481_v19  ;;  %v484_v22 = vmul.f32 %v669_v20, %v480_v13 }
 0x1ed   : > { %v470_v23 = vpop.f32.mrf.mxu1 }
 0x1ee   : > { %492 = vst.msk [vmem:[%s269_s26] sm:$0xff] %vm491_vm3, %v487_v21  ;;  %v490_v24 = vadd.f32 %v486_v15, %v484_v22  ;;  %v483_v25 = vmul.f32 %v480_v13, %v470_v23 }
 0x1f0   : > { %496 = vst.msk [vmem:[%s269_s26 + $0x18] sm:$0xf] %vm495_vm4, %v490_v24  ;;  %v489_v26 = vadd.f32 %v486_v15, %v483_v25 }
 0x1f2   : > { %494 = vst.msk [vmem:[%s269_s26 + $0x10] sm:$0xff] %vm491_vm3, %v489_v26 }
 0x1f3   : > { %812 = shalt.err (!%p809_p12)
}
 0x1f4   : > { %s813_s7 = scalar_lea.hbm %s1087_s28, 512  ;;  %s817_s16 = scalar_lea.hbm %s1137_s5, 3072 }
 0x1f5   : > { %p814_p11 = scmp.ne.s32.totalorder %s1087_s28, %s813_s7  ;;  %p818_p3 = scmp.lt.s32.totalorder %s1087_s28, %s1137_s5 }
 0x1f6   : > { %p819_p8 = scmp.lt.s32.totalorder %s817_s16, %s813_s7 }
 0x1f7   : > { %p815_p13 = pnand %p814_p11, %p1157_p1 }
 0x1f8   : > { %p820_p6 = por %p819_p8, %p818_p3 }
 0x1f9   : > { %p816_p2 = pneg %p815_p13 }
 0x1fb   : > { %p821_p10 = pnand %p820_p6, %p816_p2 }
 0x1fd   : > { %824 = shalt.err (!%p821_p10)
}
 0x1fe   : > { %s879_s9 = smov 128   ;;  %s880_s23 = smov 8  }
 0x1ff   : > { %680 = dma.vmem_to_hbm [thread:$0]  (%p1157_p1), %s1089_s8, 512, %s1087_s28, %s498_s22, %s879_s9, %s879_s9, %s880_s23  }
 0x200 PF: > { %p702_p5 = scmp.ge.s32.totalorder %s871_s21, 2  ;;  %s526_s29 = sand.u32 1, %s859_s18  }
 0x201   : > { %p1158_p0 = scmp.ne.s32.totalorder %s1146_s6, 0  ;;  %s527_s10 = scalar_lea.sflag [#allocation4], %s526_s29 }
 0x203   : > { %p694_p7 = pnand %p702_p5, %p1158_p0 }
 0x205   : > { %p695_p9 = pneg %p694_p7 }
 0x207   : > { %854 = dma.done.wait (%p695_p9), %s527_s10, 512  }
 0x208   : > { %856 = vsyncadd (%p695_p9), %s527_s10, 4294966784  ;;  %p20_p4 = scmp.ge.s32.totalorder %s936_s24, 8   ;;  %s1159_s18 = smov %s863_s19 }
 0x209   : > { %s1160_s19 = smov %s867_s20  ;;  %s1161_s20 = smov %s948_s27 }
 0x20a   : > { %s1162_s21 = smov %s936_s24  ;;  %22 = sbr.rel (!%p20_p4) target bundleno = 7 (0x7), region = 94 }
 0x20f   :  { %532 = vsyncpa [#allocation3], 1 }
 0x210   :  { %534 = vsyncpa [#allocation3 + $0x1], 1 }
 0x211   :  { %535 = vsyncpa [#allocation4], 1 }
 0x212   :  { %537 = vsyncpa [#allocation4 + $0x1], 1 }
 0x213   :  { %538 = vsyncpa [#allocation5], 1 }
 0x214   :  { %540 = vsyncpa [#allocation5 + $0x1], 1 }
 0x215   :  { %541 = vsyncpa [#allocation7], 1 }

</bundles_post_ra>
